<compile_context>
chip_gen: v7x
topology: tpu7x:2x2x1
jax: 0.10.0
libtpu: 0.0.40
codegen_flags: <defaults>
</compile_context>

<pallas_src>
import math

import numpy as np
import jax
import jax.numpy as jnp
from jax.experimental import pallas as pl
from jax.experimental.pallas import tpu as pltpu

LANE = 128  # TPU lane width: all HBM-stored output columns are padded to this


# ----------------------------------------------------------------------------
# Fused Pallas kernel
# ----------------------------------------------------------------------------
def _celu(x):
    # CELU(alpha=1) = max(0, x) + min(0, exp(min(x, 0)) - 1)
    # (exp(t)-1 for t<=0 differs from expm1 by < ~1.2e-7 absolute, well inside
    #  the 1e-4 tolerance.)  Note CELU(1) == 1 exactly, which carries the
    #  bias-folding ones column through the layers.
    return jnp.maximum(x, 0.0) + jnp.minimum(0.0, jnp.exp(jnp.minimum(x, 0.0)) - 1.0)


def _decoder_kernel(z_ref, w1_ref, w2_ref, wf_ref, out_ref):
    """Fully fused Decoder forward.  z_ref is (Bt, z_dim+1) with a trailing
    ones column; all biases live inside the weights.  out_ref is a lane-dense
    (Bt, 256) slab: cols [0,128) = point branch (padded), cols [128,256) =
    conv branch after the final 3x3 conv (padded)."""
    # Stage 1: both branches' first Linear + bias in one dot; column z_dim of
    # w1 carries the ones column forward.
    h = _celu(jnp.dot(z_ref[...], w1_ref[...], preferred_element_type=jnp.float32))
    # Stage 2: block-diagonal second Linears + biases in one dot; the point
    # output lands in cols [0,128), the conv latent activation in [128,272),
    # col 384 stays 1.
    u = _celu(jnp.dot(h, w2_ref[...], preferred_element_type=jnp.float32))
    # Point half: already final (CELU'd), just store the lane-aligned slice.
    out_ref[:, :LANE] = u[:, :LANE]
    # Conv half: final init_layer Conv2d(3x3, stride 1, padding 1) as a dense
    # Toeplitz matmul over the NCHW-flattened activation (bias in wf's last
    # row, consumed by u's ones column).  Rows of wf matching the point half /
    # padding of u are zero, so no slicing of u is needed.
    out_ref[:, LANE:] = jnp.dot(u, wf_ref[...], preferred_element_type=jnp.float32)


# ----------------------------------------------------------------------------
# Wrapper around the single fused pallas_call
# ----------------------------------------------------------------------------
def decoder_forward(z, kp, *, point_in_shape, conv_in_shape, conv_out_channels,
                    row_tile=256):
    B = z.shape[0]
    w1, w2, wf = kp["w1"], kp["w2"], kp["wf"]
    out_w = 2 * LANE

    # Pad B up to a multiple of 8 (full sublane tiles -> unmasked stores) and,
    # in the SAME pad op, append the constant-1 bias-folding column.
    BP = -(-B // 8) * 8
    nb = 1 if BP <= row_tile else -(-BP // row_tile)
    tb = BP if nb == 1 else row_tile
    BP = nb * tb
    z_aug = jnp.pad(z, ((0, BP - B), (0, 1)), constant_values=1.0)

    if nb == 1:
        # Single shot, no grid: a 1-step grid would only add pipeline
        # prologue/epilogue overhead at this size.
        vmem = pl.BlockSpec(memory_space=pltpu.MemorySpace.VMEM)
        slab = pl.pallas_call(
            _decoder_kernel,
            out_shape=jax.ShapeDtypeStruct((BP, out_w), jnp.float32),
            in_specs=[vmem, vmem, vmem, vmem],
            out_specs=vmem,
        )(z_aug, w1, w2, wf)
    else:
        # Larger batches: tile over rows; "parallel" lets v7x's two TensorCores
        # split the batch.  Weights use the same block every step (resident).
        slab = pl.pallas_call(
            _decoder_kernel,
            out_shape=jax.ShapeDtypeStruct((BP, out_w), jnp.float32),
            grid=(nb,),
            in_specs=[
                pl.BlockSpec((tb, z_aug.shape[1]), lambda i: (i, 0)),
                pl.BlockSpec(w1.shape, lambda i: (0, 0)),
                pl.BlockSpec(w2.shape, lambda i: (0, 0)),
                pl.BlockSpec(wf.shape, lambda i: (0, 0)),
            ],
            out_specs=pl.BlockSpec((tb, out_w), lambda i: (i, 0)),
            compiler_params=pltpu.CompilerParams(
                dimension_semantics=("parallel",)),
        )(z_aug, w1, w2, wf)

    p_numel = math.prod(point_in_shape[1:])
    Co = conv_out_channels
    H, W = conv_in_shape[2], conv_in_shape[3]
    pf = slab[:B, :p_numel].reshape(B, *point_in_shape[1:])          # nn.Unflatten
    vf = slab[:B, LANE:LANE + Co * H * W].reshape(B, Co, H, W)       # NCHW
    return pf, vf


# ----------------------------------------------------------------------------
# Parameter setup (deterministic, synthetic) and one-time kernel-layout prep
# ----------------------------------------------------------------------------
def spectral_normalize(w):
    # torch spectral_norm at convergence: W / sigma_max(W)
    sigma = jnp.linalg.svd(w, compute_uv=False)[0]
    return w / sigma


def make_params(key, *, point_latent_dim, conv_latent_dim, point_in_shape,
                conv_in_shape, conv_out_channels, ksize):
    ks = jax.random.split(key, 10)

    def init(k, shape, scale=0.2):
        return (scale * jax.random.normal(k, shape)).astype(jnp.float32)

    p_numel = math.prod(point_in_shape)   # point_in_shape.numel()
    c_numel = math.prod(conv_in_shape)    # conv_in_shape.numel()
    c_in = conv_in_shape[1]
    return dict(
        pw1=spectral_normalize(init(ks[0], (point_latent_dim, point_latent_dim))),
        pb1=init(ks[1], (point_latent_dim,)),
        pw2=spectral_normalize(init(ks[2], (p_numel, point_latent_dim))),
        pb2=init(ks[3], (p_numel,)),
        cw1=spectral_normalize(init(ks[4], (conv_latent_dim, conv_latent_dim))),
        cb1=init(ks[5], (conv_latent_dim,)),
        cw2=spectral_normalize(init(ks[6], (c_numel, conv_latent_dim))),
        cb2=init(ks[7], (c_numel,)),
        conv_w=init(ks[8], (conv_out_channels, c_in, ksize, ksize)),
        conv_b=init(ks[9], (conv_out_channels,)),
    )


def _conv_toeplitz(w, H, W):
    """Dense (Ci*H*W, Co*H*W) matrix equivalent to a stride-1 'same' 2D conv on
    the NCHW-flattened activation (zero padding baked in)."""
    w = np.asarray(w, dtype=np.float32)
    Co, Ci, K, _ = w.shape
    pad = K // 2
    T = np.zeros((Ci * H * W, Co * H * W), dtype=np.float32)
    for co in range(Co):
        for ci in range(Ci):
            for kh in range(K):
                for kw in range(K):
                    for ho in range(H):
                        hi = ho + kh - pad
                        if hi < 0 or hi >= H:
                            continue
                        for wo in range(W):
                            wi = wo + kw - pad
                            if wi < 0 or wi >= W:
                                continue
                            T[ci * H * W + hi * W + wi,
                              co * H * W + ho * W + wo] = w[co, ci, kh, kw]
    return T


def prepare_kernel_params(params, *, point_latent_dim, conv_latent_dim,
                          point_in_shape, conv_in_shape, conv_out_channels):
    """Fuse/pre-transpose/zero-pad all weights ONCE so the fused kernel is
    exactly 3 dots + 2 CELUs with 4 operands and one lane-dense output slab."""
    p_numel = math.prod(point_in_shape)
    c_numel = math.prod(conv_in_shape)
    H, W = conv_in_shape[2], conv_in_shape[3]
    Co = conv_out_channels
    p_ld, c_ld = point_latent_dim, conv_latent_dim
    zd = p_ld + c_ld
    # Lane-dense slab layout assumptions (see TODO at the bottom for scaling).
    assert p_numel <= LANE and Co * H * W <= LANE and c_numel <= 2 * LANE

    def npf(x):
        return np.asarray(x, dtype=np.float32)

    # Stage 1: both first Linears fused; biases in the last row (consumed by
    # the ones column appended to z); last column carries the one forward.
    w1 = np.zeros((zd + 1, zd + 1), np.float32)
    w1[:p_ld, :p_ld] = npf(params["pw1"]).T
    w1[p_ld:zd, p_ld:zd] = npf(params["cw1"]).T
    w1[zd, :p_ld] = npf(params["pb1"])
    w1[zd, p_ld:zd] = npf(params["cb1"])
    w1[zd, zd] = 1.0

    # Stage 2: block-diagonal second Linears; point half padded to LANE cols,
    # conv half to 2*LANE; biases folded; ones column carried in col 3*LANE.
    w2 = np.zeros((zd + 1, 3 * LANE + 1), np.float32)
    w2[:p_ld, :p_numel] = npf(params["pw2"]).T
    w2[p_ld:zd, LANE:LANE + c_numel] = npf(params["cw2"]).T
    w2[zd, :p_numel] = npf(params["pb2"])
    w2[zd, LANE:LANE + c_numel] = npf(params["cb2"])
    w2[zd, 3 * LANE] = 1.0

    # Stage 3: final Conv2d as a Toeplitz matmul over cols [LANE, LANE+c_numel)
    # of u; rows matching the point half / zero padding of u are zero; the conv
    # bias lives in the last row (consumed by u's ones column).
    T = _conv_toeplitz(params["conv_w"], H, W)          # (c_numel, Co*H*W)
    wf = np.zeros((3 * LANE + 1, LANE), np.float32)
    wf[LANE:LANE + c_numel, :Co * H * W] = T
    wf[3 * LANE, :Co * H * W] = np.repeat(npf(params["conv_b"]), H * W)

    # TODO(synk): on v6e/v7x store w1/w2/wf in bfloat16 (keep fp32 accumulate)
    # once tolerances allow; kept fp32 here to match the fp32 reference to 1e-4.
    return dict(w1=jnp.asarray(w1), w2=jnp.asarray(w2), wf=jnp.asarray(wf))


# ----------------------------------------------------------------------------
# Reference (pure JAX) for a correctness sanity check
# ----------------------------------------------------------------------------
def _celu_ref(x):
    return jnp.maximum(x, 0.0) + jnp.minimum(0.0, jnp.expm1(jnp.minimum(x, 0.0)))


def decoder_forward_ref(z, params, *, point_latent_dim, point_in_shape, conv_in_shape):
    B = z.shape[0]
    zp = z[:, :point_latent_dim]
    zv = z[:, point_latent_dim:]
    pf = _celu_ref(_celu_ref(zp @ params["pw1"].T + params["pb1"]) @ params["pw2"].T
                   + params["pb2"]).reshape(B, *point_in_shape[1:])
    vf = _celu_ref(_celu_ref(zv @ params["cw1"].T + params["cb1"]) @ params["cw2"].T
                   + params["cb2"]).reshape(B, *conv_in_shape[1:])
    vf = jax.lax.conv_general_dilated(
        vf, params["conv_w"], window_strides=(1, 1), padding="SAME",
        dimension_numbers=("NCHW", "OIHW", "NCHW"),
    ) + params["conv_b"].reshape(1, -1, 1, 1)
    return pf, vf


# ----------------------------------------------------------------------------
if __name__ == "__main__":
    B = 2
    point_latent_dim = 8
    conv_latent_dim = 24
    point_in_shape = (1, 4, 8)       # (dummy batch, Cp, Np)  -> numel = 32
    conv_in_shape = (1, 4, 6, 6)     # (dummy batch, C, H, W) -> numel = 144
    conv_out_channels = 3
    K = 3

    key = jax.random.PRNGKey(0)
    kz, kp = jax.random.split(key)
    z = jax.random.normal(kz, (B, point_latent_dim + conv_latent_dim), dtype=jnp.float32)

    params = make_params(
        kp,
        point_latent_dim=point_latent_dim,
        conv_latent_dim=conv_latent_dim,
        point_in_shape=point_in_shape,
        conv_in_shape=conv_in_shape,
        conv_out_channels=conv_out_channels,
        ksize=K,
    )
    kparams = prepare_kernel_params(
        params,
        point_latent_dim=point_latent_dim,
        conv_latent_dim=conv_latent_dim,
        point_in_shape=point_in_shape,
        conv_in_shape=conv_in_shape,
        conv_out_channels=conv_out_channels,
    )

    # TODO(synk): PointBlock / PoolBlock stages are not defined in the provided
    # source; the forward below covers the latent MLPs + final init_layer Conv2d
    # (i.e. conv_stages=1, point_stages=0).  The dense Toeplitz conv and the
    # 128-lane output slab only hold at these toy sizes; real stages need a
    # shifted-matmul / in-VMEM-im2col conv instead.
    fwd = jax.jit(
        lambda zz: decoder_forward(
            zz, kparams,
            point_in_shape=point_in_shape,
            conv_in_shape=conv_in_shape,
            conv_out_channels=conv_out_channels,
        )
    )

    # Small-batch path (no grid, single fused call).
    pf, vf = fwd(z)
    jax.block_until_ready((pf, vf))
    pf_ref, vf_ref = decoder_forward_ref(
        z, params,
        point_latent_dim=point_latent_dim,
        point_in_shape=point_in_shape,
        conv_in_shape=conv_in_shape,
    )
    assert pf.shape == (B, 4, 8) and vf.shape == (B, conv_out_channels, 6, 6)
    assert jnp.allclose(pf, pf_ref, atol=1e-4, rtol=1e-4)
    assert jnp.allclose(vf, vf_ref, atol=1e-4, rtol=1e-4)

    # Larger batch exercises the row-tiled, "parallel" grid path (v7x 2 TCs).
    B2 = 300
    z2 = jax.random.normal(jax.random.PRNGKey(1),
                           (B2, point_latent_dim + conv_latent_dim), dtype=jnp.float32)
    pf2, vf2 = fwd(z2)
    jax.block_until_ready((pf2, vf2))
    pf2_ref, vf2_ref = decoder_forward_ref(
        z2, params,
        point_latent_dim=point_latent_dim,
        point_in_shape=point_in_shape,
        conv_in_shape=conv_in_shape,
    )
    assert pf2.shape == (B2, 4, 8) and vf2.shape == (B2, conv_out_channels, 6, 6)
    assert jnp.allclose(pf2, pf2_ref, atol=1e-4, rtol=1e-4)
    assert jnp.allclose(vf2, vf2_ref, atol=1e-4, rtol=1e-4)

    print("KERNEL_OK")
</pallas_src>

<mosaic_0001>
module attributes {stable_mosaic.version = 11 : i64} {
  func.func @_decoder_kernel(%arg0: memref<8x33xf32, #tpu.memory_space<vmem>>, %arg1: memref<33x33xf32, #tpu.memory_space<vmem>>, %arg2: memref<33x385xf32, #tpu.memory_space<vmem>>, %arg3: memref<385x128xf32, #tpu.memory_space<vmem>>, %arg4: memref<8x256xf32, #tpu.memory_space<vmem>>) attributes {dimension_semantics = [], scalar_prefetch = 0 : i64, scratch_operands = 0 : i64, tpu.core_type = #tpu.core_type<tc>} {
    %c0 = arith.constant 0 : index
    %c0_0 = arith.constant 0 : index
    %0 = vector.load %arg0[%c0, %c0_0] : memref<8x33xf32, #tpu.memory_space<vmem>>, vector<8x33xf32>
    %c0_1 = arith.constant 0 : index
    %c0_2 = arith.constant 0 : index
    %1 = vector.load %arg1[%c0_1, %c0_2] : memref<33x33xf32, #tpu.memory_space<vmem>>, vector<33x33xf32>
    %cst = arith.constant dense<0.000000e+00> : vector<8x33xf32>
    %2 = tpu.matmul %0, %1, %cst {dimension_numbers = #tpu.dot_dimension_numbers<[1], [0], [0], [1], [0, 0, 1, 1], [], []>} : vector<8x33xf32>, vector<33x33xf32>, vector<8x33xf32> -> vector<8x33xf32>
    %cst_3 = arith.constant 0.000000e+00 : f32
    %3 = vector.broadcast %cst_3 : f32 to vector<8x33xf32>
    %4 = arith.maximumf %2, %3 : vector<8x33xf32>
    %cst_4 = arith.constant 0.000000e+00 : f32
    %5 = vector.broadcast %cst_4 : f32 to vector<8x33xf32>
    %6 = arith.minimumf %2, %5 : vector<8x33xf32>
    %7 = math.exp %6 : vector<8x33xf32>
    %cst_5 = arith.constant 1.000000e+00 : f32
    %8 = vector.broadcast %cst_5 : f32 to vector<8x33xf32>
    %9 = arith.subf %7, %8 : vector<8x33xf32>
    %cst_6 = arith.constant 0.000000e+00 : f32
    %10 = vector.broadcast %cst_6 : f32 to vector<8x33xf32>
    %11 = arith.minimumf %10, %9 : vector<8x33xf32>
    %12 = arith.addf %4, %11 : vector<8x33xf32>
    %c0_7 = arith.constant 0 : index
    %c0_8 = arith.constant 0 : index
    %13 = vector.load %arg2[%c0_7, %c0_8] : memref<33x385xf32, #tpu.memory_space<vmem>>, vector<33x385xf32>
    %cst_9 = arith.constant dense<0.000000e+00> : vector<8x385xf32>
    %14 = tpu.matmul %12, %13, %cst_9 {dimension_numbers = #tpu.dot_dimension_numbers<[1], [0], [0], [1], [0, 0, 1, 1], [], []>} : vector<8x33xf32>, vector<33x385xf32>, vector<8x385xf32> -> vector<8x385xf32>
    %cst_10 = arith.constant 0.000000e+00 : f32
    %15 = vector.broadcast %cst_10 : f32 to vector<8x385xf32>
    %16 = arith.maximumf %14, %15 : vector<8x385xf32>
    %cst_11 = arith.constant 0.000000e+00 : f32
    %17 = vector.broadcast %cst_11 : f32 to vector<8x385xf32>
    %18 = arith.minimumf %14, %17 : vector<8x385xf32>
    %19 = math.exp %18 : vector<8x385xf32>
    %cst_12 = arith.constant 1.000000e+00 : f32
    %20 = vector.broadcast %cst_12 : f32 to vector<8x385xf32>
    %21 = arith.subf %19, %20 : vector<8x385xf32>
    %cst_13 = arith.constant 0.000000e+00 : f32
    %22 = vector.broadcast %cst_13 : f32 to vector<8x385xf32>
    %23 = arith.minimumf %22, %21 : vector<8x385xf32>
    %24 = arith.addf %16, %23 : vector<8x385xf32>
    %25 = vector.extract_strided_slice %24 {offsets = [0, 0], sizes = [8, 128], strides = [1, 1]} : vector<8x385xf32> to vector<8x128xf32>
    %c0_14 = arith.constant 0 : index
    %c0_15 = arith.constant 0 : index
    %26 = vector.load %arg4[%c0_14, %c0_15] : memref<8x256xf32, #tpu.memory_space<vmem>>, vector<8x128xf32>
    tpu.vector_store %arg4[%c0_14, %c0_15], %25 {strides = array<i32>} : memref<8x256xf32, #tpu.memory_space<vmem>>, vector<8x128xf32>,
    %c0_16 = arith.constant 0 : index
    %c0_17 = arith.constant 0 : index
    %27 = vector.load %arg3[%c0_16, %c0_17] : memref<385x128xf32, #tpu.memory_space<vmem>>, vector<385x128xf32>
    %cst_18 = arith.constant dense<0.000000e+00> : vector<8x128xf32>
    %28 = tpu.matmul %24, %27, %cst_18 {dimension_numbers = #tpu.dot_dimension_numbers<[1], [0], [0], [1], [0, 0, 1, 1], [], []>} : vector<8x385xf32>, vector<385x128xf32>, vector<8x128xf32> -> vector<8x128xf32>
    %c0_19 = arith.constant 0 : index
    %c128 = arith.constant 128 : index
    %29 = vector.load %arg4[%c0_19, %c128] : memref<8x256xf32, #tpu.memory_space<vmem>>, vector<8x128xf32>
    tpu.vector_store %arg4[%c0_19, %c128], %28 {strides = array<i32>} : memref<8x256xf32, #tpu.memory_space<vmem>>, vector<8x128xf32>,
    return
  }
}

</mosaic_0001>

<bundles_post_ra>
// kernel: _lambda_.1
= control target key start
LH: loop header
LB: loop body
LE: loop exit
PB: predicated region body
PF: predicated region fallthrough
CT: control target
= control target key end

     0   :  { %9 = vsyncpa [#allocation3], 0  ;;  %s899_s0 = inlined_call_operand.vmem [shape: f32[8,33], index: 0, kind: input, shape index: {}]   ;;  %s900_s1 = inlined_call_operand.hbm [shape: f32[33,33], index: 1, kind: input, shape index: {}]   ;;  %s901_s2 = inlined_call_operand.hbm [shape: f32[33,385], index: 2, kind: input, shape index: {}]   ;;  %s902_s3 = inlined_call_operand.hbm [shape: f32[385,128], index: 3, kind: input, shape index: {}]   ;;  %s903_s4 = inlined_call_operand.vmem [shape: f32[8,256], index: 4, kind: output, shape index: {}]  }
   0x1   :  { %10 = vsyncpa [#allocation5], 0  ;;  %s795_s15 = smov [#allocation4]   ;;  %s725_s19 = scalar_lea.hbm %s901_s2, 2560 }
   0x2   :  { %s30_s16 = sshll.u32 %s795_s15, 4  ;;  %p726_p0 = scmp.ne.s32.totalorder %s901_s2, %s725_s19  ;;  %s31_s16 = int_to_ptr.vmem [resolvable:$true] %s30_s16 }
   0x3   :  { %p729_p1 = scmp.lt.u32.totalorder %s725_s19, %s901_s2 }
   0x5   :  { %p731_p2 = pnand %p729_p1, %p726_p0 }
   0x7   :  { %734 = shalt.err (!%p731_p2)
}
   0x8   :  { %s735_s24 = scalar_lea.vmem %s31_s16, 2560  ;;  %p740_p4 = scmp.lt.s32.totalorder %s31_s16, %s31_s16 }
   0x9   :  { %p736_p3 = scmp.ne.s32.totalorder %s31_s16, %s735_s24  ;;  %p741_p5 = scmp.lt.s32.totalorder %s735_s24, %s735_s24 }
   0xb   :  { %p742_p6 = por %p741_p5, %p740_p4 }
   0xd   :  { %p743_p7 = pnand %p742_p6, %p736_p3 }
   0xf   :  { %746 = shalt.err (!%p743_p7)
}
  0x10   :  { %s796_s25 = smov 512   ;;  %s797_s26 = smov 32  }
  0x11   :  { %36 = dma.hbm_to_vmem [thread:$0]  %s901_s2, 2560, %s31_s16, [#allocation5], %s796_s25, %s796_s25, %s797_s26  }
  0x12   :  { %s798_s29 = smov [#allocation2]   ;;  %s747_s7 = scalar_lea.hbm %s900_s1, 640 }
  0x13   :  { %s18_s30 = sshll.u32 %s798_s29, 4  ;;  %p748_p8 = scmp.ne.s32.totalorder %s900_s1, %s747_s7  ;;  %s19_s30 = int_to_ptr.vmem [resolvable:$true] %s18_s30 }
  0x14   :  { %p751_p9 = scmp.lt.u32.totalorder %s747_s7, %s900_s1 }
  0x16   :  { %p753_p10 = pnand %p751_p9, %p748_p8 }
  0x18   :  { %756 = shalt.err (!%p753_p10)
}
  0x19   :  { %s757_s12 = scalar_lea.vmem %s19_s30, 640  ;;  %p762_p12 = scmp.lt.s32.totalorder %s19_s30, %s19_s30 }
  0x1a   :  { %p758_p11 = scmp.ne.s32.totalorder %s19_s30, %s757_s12  ;;  %p763_p13 = scmp.lt.s32.totalorder %s757_s12, %s757_s12 }
  0x1c   :  { %p764_p0 = por %p763_p13, %p762_p12 }
  0x1e   :  { %p765_p1 = pnand %p764_p0, %p758_p11 }
  0x20   :  { %768 = shalt.err (!%p765_p1)
}
  0x21   :  { %s799_s2 = smov 128   ;;  %s800_s13 = smov 8  }
  0x22   :  { %24 = dma.hbm_to_vmem [thread:$0]  %s900_s1, 640, %s19_s30, [#allocation3], %s799_s2, %s799_s2, %s800_s13  }
  0x23   :  { %s801_s16 = smov [#allocation6]   ;;  %s769_s20 = scalar_lea.hbm %s902_s3, 6272 }
  0x24   :  { %s42_s17 = sshll.u32 %s801_s16, 4  ;;  %p770_p2 = scmp.ne.s32.totalorder %s902_s3, %s769_s20  ;;  %s43_s17 = int_to_ptr.vmem [resolvable:$true] %s42_s17 }
  0x25   :  { %p773_p3 = scmp.lt.u32.totalorder %s769_s20, %s902_s3 }
  0x27   :  { %p775_p4 = pnand %p773_p3, %p770_p2 }
  0x29   :  { %778 = shalt.err (!%p775_p4)
}
  0x2a   :  { %s779_s25 = scalar_lea.vmem %s43_s17, 6272  ;;  %p784_p6 = scmp.lt.s32.totalorder %s43_s17, %s43_s17 }
  0x2b   :  { %p780_p5 = scmp.ne.s32.totalorder %s43_s17, %s779_s25  ;;  %p785_p7 = scmp.lt.s32.totalorder %s779_s25, %s779_s25 }
  0x2d   :  { %p786_p8 = por %p785_p7, %p784_p6 }
  0x2f   :  { %p787_p9 = pnand %p786_p8, %p780_p5 }
  0x31   :  { %790 = shalt.err (!%p787_p9)
}
  0x32   :  { %48 = dma.hbm_to_vmem [thread:$0]  %s902_s3, 6272, %s43_s17, [#allocation5], %s799_s2, %s799_s2, %s800_s13  }
  0x33   :  { %791 = dma.done.wait [#allocation3], 640  }
  0x34   :  { %792 = vsyncadd [#allocation3], 4294966656 }
  0x35   :  { %793 = dma.done.wait [#allocation5], 8832  }
  0x36   :  { %794 = vsyncadd [#allocation5], 4294958464  ;;  %v802_v0 = vmov 0.0|0.0   ;;  %vm803_vm0 = vmmov 0   ;;  %v804_v1 = vmov 0.0   ;;  %v59_v2 = vld [vmem:[#allocation2] sm:$0xff] }
  0x37   :  { %627 = vmatprep.subr.bf16.mxu1 %v802_v0  ;;  %624 = vmatprep.mubr.msk.f32.mxu1 %vm803_vm0, %v804_v1  ;;  %v60_v3 = vld [vmem:[#allocation2 + $0x8] sm:$0xff]  ;;  %v61_v4 = vld [vmem:[#allocation2 + $0x10] sm:$0xff]  ;;  %v62_v6 = vld [vmem:[#allocation2 + $0x18] sm:$0xff]  ;;  %vm68_vm1 = vcmask 1040384   ;;  %vm64_vm2 = vcmask 269312   ;;  %vm404_vm3 = vcmask 7168  }
  0x38   :  { %319 = vmatprep.mubr.f32.mxu0 %v804_v1  ;;  %v628_v5 = vpack.c.bf16 %v60_v3, %v59_v2  ;;  %v631_v7 = vpack.c.bf16 %v62_v6, %v61_v4  ;;  %v63_v8 = vld [vmem:[#allocation2 + $0x20] sm:$0x1]  ;;  %v150_v10 = vld [vmem:[#allocation4 + $0x8] sm:$0xff]  ;;  %v149_v15 = vld [vmem:[#allocation4] sm:$0xff] }
  0x39   :  { %v58_v9 = vld [vmem:[%s899_s0] sm:$0xff]  ;;  %v154_v11 = vld [vmem:[#allocation4 + $0x28] sm:$0xff]  ;;  %v153_v16 = vld [vmem:[#allocation4 + $0x20] sm:$0xff] }
  0x3a   :  { %629 = vmatpush3.bf16.msra.mxu1 %v628_v5  ;;  %v152_v12 = vld [vmem:[#allocation4 + $0x18] sm:$0xff]  ;;  %v633_v13 = vpack.c.bf16 %v154_v11, %v150_v10  ;;  %v635_v18 = vpack.c.bf16 %v153_v16, %v149_v15  ;;  %v151_v19 = vld [vmem:[#allocation4 + $0x10] sm:$0xff]  ;;  %v158_v22 = vld [vmem:[#allocation4 + $0x48] sm:$0xff] }
  0x3b   :  { %630 = vmatprep.subr.bf16.mxu1 %v802_v0  ;;  %v156_v14 = vld [vmem:[#allocation4 + $0x38] sm:$0xff]  ;;  %v155_v20 = vld [vmem:[#allocation4 + $0x30] sm:$0xff]  ;;  %v162_v23 = vld [vmem:[#allocation4 + $0x68] sm:$0xff] }
  0x3c   :  { %v641_v17 = vpack.c.bf16 %v156_v14, %v152_v12  ;;  %v643_v21 = vpack.c.bf16 %v155_v20, %v151_v19  ;;  %v160_v24 = vld [vmem:[#allocation4 + $0x58] sm:$0xff]  ;;  %v637_v25 = vpack.c.bf16 %v162_v23, %v158_v22  ;;  %v157_v27 = vld [vmem:[#allocation4 + $0x40] sm:$0xff]  ;;  %v159_v31 = vld [vmem:[#allocation4 + $0x50] sm:$0xff] }
  0x3d   :  { %v164_v26 = vld [vmem:[#allocation4 + $0x78] sm:$0xff]  ;;  %v161_v28 = vld [vmem:[#allocation4 + $0x60] sm:$0xff]  ;;  %v163_v32 = vld [vmem:[#allocation4 + $0x70] sm:$0xff] }
  0x3e   :  { %632 = vmatpush3.bf16.msra.mxu1 %v631_v7  ;;  %642 = vmatprep.subr.bf16.mxu0 %v641_v17  ;;  %v645_v29 = vpack.c.bf16 %v164_v26, %v160_v24  ;;  %v639_v30 = vpack.c.bf16 %v161_v28, %v157_v27  ;;  %v647_v33 = vpack.c.bf16 %v163_v32, %v159_v31  ;;  %v166_v34 = vld [vmem:[#allocation4 + $0x88] sm:$0x1]  ;;  %v168_v35 = vld [vmem:[#allocation4 + $0x98] sm:$0x1]  ;;  %v165_v36 = vld [vmem:[#allocation4 + $0x80] sm:$0x1] }
  0x3f   :  { %622 = vmatprep.subr.mxu1 %v804_v1  ;;  %644 = vmatpush1.bf16.msra.mxu0 %v643_v21  ;;  %v167_v37 = vld [vmem:[#allocation4 + $0x90] sm:$0x1]  ;;  %v371_v38 = vld [vmem:[#allocation6 + $0x80] sm:$0xff]  ;;  %v372_v39 = vld [vmem:[#allocation6 + $0x88] sm:$0xff] }
  0x40   :  { %646 = vmatprep.subr.bf16.mxu0 %v645_v29  ;;  %v649_v40 = vpack.c.bf16 %v372_v39, %v371_v38  ;;  %v387_v46 = vld [vmem:[#allocation6 + $0x100] sm:$0xff]  ;;  %v388_v48 = vld [vmem:[#allocation6 + $0x108] sm:$0xff]  ;;  %v373_v51 = vld [vmem:[#allocation6 + $0x90] sm:$0xff] }
  0x41   :  { %v355_v49 = vld [vmem:[#allocation6] sm:$0xff]  ;;  %v356_v50 = vld [vmem:[#allocation6 + $0x8] sm:$0xff]  ;;  %v374_v52 = vld [vmem:[#allocation6 + $0x98] sm:$0xff]  ;;  %v682_v55 = vpack.c.bf16 %v388_v48, %v387_v46 }
  0x42   :  { %623 = vmatpush3.msk.msra.mxu1 %vm68_vm1, %v63_v8  ;;  %v651_v56 = vpack.c.bf16 %v356_v50, %v355_v49  ;;  %v389_v57 = vld [vmem:[#allocation6 + $0x110] sm:$0xff]  ;;  %v390_v59 = vld [vmem:[#allocation6 + $0x118] sm:$0xff]  ;;  %v653_v60 = vpack.c.bf16 %v374_v52, %v373_v51  ;;  %v391_v3 = vld [vmem:[#allocation6 + $0x120] sm:$0xff] }
  0x43   :  { %625 = vmatmul.mubr.msk.f32.vlgmr.msra.gmra.mrb[0].mxu1 %vm64_vm2, %v58_v9  ;;  %634 = vmatprep.subr.bf16.mxu1 %v633_v13  ;;  %v357_v61 = vld [vmem:[#allocation6 + $0x10] sm:$0xff]  ;;  %v358_v62 = vld [vmem:[#allocation6 + $0x18] sm:$0xff]  ;;  %v685_v63 = vpack.c.bf16 %v390_v59, %v389_v57  ;;  %v392_v4 = vld [vmem:[#allocation6 + $0x128] sm:$0xff] }
  0x44   :  { %248 = vmatprep.mubr.f32.mxu1 %v804_v1  ;;  %636 = vmatpush1.bf16.msra.mxu1 %v635_v18  ;;  %v655_v2 = vpack.c.bf16 %v358_v62, %v357_v61  ;;  %v688_v5 = vpack.c.bf16 %v392_v4, %v391_v3  ;;  %v375_v6 = vld [vmem:[#allocation6 + $0xa0] sm:$0xff]  ;;  %v376_v7 = vld [vmem:[#allocation6 + $0xa8] sm:$0xff]  ;;  %v393_v12 = vld [vmem:[#allocation6 + $0x130] sm:$0xff] }
  0x45   :  { %638 = vmatprep.subr.bf16.mxu1 %v637_v25  ;;  %648 = vmatpush1.bf16.msra.mxu0 %v647_v33  ;;  %v657_v8 = vpack.c.bf16 %v376_v7, %v375_v6  ;;  %v359_v9 = vld [vmem:[#allocation6 + $0x20] sm:$0xff]  ;;  %v360_v10 = vld [vmem:[#allocation6 + $0x28] sm:$0xff]  ;;  %v394_v13 = vld [vmem:[#allocation6 + $0x138] sm:$0xff] }
  0x46   :  { %564 = vmatprep.subr.msk.mxu0 %vm68_vm1, %v168_v35  ;;  %v659_v11 = vpack.c.bf16 %v360_v10, %v359_v9  ;;  %v691_v14 = vpack.c.bf16 %v394_v13, %v393_v12  ;;  %v377_v15 = vld [vmem:[#allocation6 + $0xb0] sm:$0xff]  ;;  %v378_v16 = vld [vmem:[#allocation6 + $0xb8] sm:$0xff]  ;;  %v395_v21 = vld [vmem:[#allocation6 + $0x140] sm:$0xff] }
  0x47   :  { %v661_v17 = vpack.c.bf16 %v378_v16, %v377_v15  ;;  %v361_v18 = vld [vmem:[#allocation6 + $0x30] sm:$0xff]  ;;  %v362_v19 = vld [vmem:[#allocation6 + $0x38] sm:$0xff]  ;;  %v396_v22 = vld [vmem:[#allocation6 + $0x148] sm:$0xff] }
  0x48   :  { %640 = vmatpush1.bf16.msra.mxu1 %v639_v30  ;;  %v663_v20 = vpack.c.bf16 %v362_v19, %v361_v18  ;;  %v694_v23 = vpack.c.bf16 %v396_v22, %v395_v21  ;;  %v379_v24 = vld [vmem:[#allocation6 + $0xc0] sm:$0xff]  ;;  %v380_v25 = vld [vmem:[#allocation6 + $0xc8] sm:$0xff]  ;;  %v397_v30 = vld [vmem:[#allocation6 + $0x150] sm:$0xff] }
  0x49   :  { %561 = vmatprep.subr.msk.mxu1 %vm68_vm1, %v166_v34  ;;  %565 = vmatpush1.msk.msra.mxu0 %vm68_vm1, %v167_v37  ;;  %v665_v26 = vpack.c.bf16 %v380_v25, %v379_v24  ;;  %v363_v27 = vld [vmem:[#allocation6 + $0x40] sm:$0xff]  ;;  %v364_v28 = vld [vmem:[#allocation6 + $0x48] sm:$0xff]  ;;  %v398_v31 = vld [vmem:[#allocation6 + $0x158] sm:$0xff] }
  0x4a   :  { %681 = vmatprep.subr.bf16.mxu0 %v802_v0  ;;  %v667_v29 = vpack.c.bf16 %v364_v28, %v363_v27  ;;  %v697_v32 = vpack.c.bf16 %v398_v31, %v397_v30  ;;  %v381_v33 = vld [vmem:[#allocation6 + $0xd0] sm:$0xff]  ;;  %v382_v34 = vld [vmem:[#allocation6 + $0xd8] sm:$0xff]  ;;  %v399_v39 = vld [vmem:[#allocation6 + $0x160] sm:$0xff] }
  0x4b   :  { %v669_v35 = vpack.c.bf16 %v382_v34, %v381_v33  ;;  %v366_v37 = vld [vmem:[#allocation6 + $0x58] sm:$0xff]  ;;  %v368_v46 = vld [vmem:[#allocation6 + $0x68] sm:$0xff]  ;;  %v401_v48 = vld [vmem:[#allocation6 + $0x170] sm:$0xff] }
  0x4c   :  { %562 = vmatpush1.msk.msra.mxu1 %vm68_vm1, %v165_v36  ;;  %v365_v36 = vld [vmem:[#allocation6 + $0x50] sm:$0xff]  ;;  %v402_v49 = vld [vmem:[#allocation6 + $0x178] sm:$0xff]  ;;  %v403_v57 = vld [vmem:[#allocation6 + $0x180] sm:$0x1] }
  0x4d   :  { %650 = vmatprep.subr.bf16.mxu1 %v649_v40  ;;  %v671_v38 = vpack.c.bf16 %v366_v37, %v365_v36  ;;  %v400_v40 = vld [vmem:[#allocation6 + $0x168] sm:$0xff]  ;;  %v703_v50 = vpack.c.bf16 %v402_v49, %v401_v48  ;;  %v385_v51 = vld [vmem:[#allocation6 + $0xf0] sm:$0xff]  ;;  %v386_v52 = vld [vmem:[#allocation6 + $0xf8] sm:$0xff] }
 0x116   :  { %v138_v41 = vpop.f32.mrb[0].mxu1 }
 0x117   :  { %v143_v42 = vmin.f32 %v138_v41, 0.0  ;;  %v626_v43 = vpop.f32.mrb[1].mxu1  ;;  %v142_v53 = vmax.f32 %v138_v41, 0.0  ;;  %v700_v41 = vpack.c.bf16 %v400_v40, %v399_v39 }
 0x118   :  { %v384_v43 = vld [vmem:[#allocation6 + $0xe8] sm:$0xff] }
 0x119   :  { %v144_v44 = vmul.f32 1.442695, %v143_v42  ;;  %v383_v42 = vld [vmem:[#allocation6 + $0xe0] sm:$0xff] }
 0x11b   :  { %715 = vpow2.f32 %v144_v44  ;;  %v673_v44 = vpack.c.bf16 %v384_v43, %v383_v42 }
 0x125   :  { %v716_v45 = vpop.eup %715 }
 0x126   :  { %v560_v47 = vadd.f32 -1.0, %v716_v45  ;;  %v367_v45 = vld [vmem:[#allocation6 + $0x60] sm:$0xff] }
 0x128   :  { %v147_v54 = vmin.f32 %v560_v47, 0.0  ;;  %v675_v47 = vpack.c.bf16 %v368_v46, %v367_v45 }
 0x12a   :  { %v148_v58 = vadd.f32 %v147_v54, %v142_v53  ;;  %v677_v53 = vpack.c.bf16 %v386_v52, %v385_v51  ;;  %v369_v54 = vld [vmem:[#allocation6 + $0x70] sm:$0xff] }
 0x12c   :  { %563 = vmatmul.mubr.msk.f32.vlgmr.msra.gmra.mrb[2].mxu1 %vm64_vm2, %v148_v58  ;;  %566 = vmatmul.mubr.msk.f32.vlgmr.msra.gmra.mrb[0].mxu0 %vm64_vm2, %v148_v58 }
 0x12d   :  { %683 = vmatpush1.bf16.msra.mxu0 %v682_v55  ;;  %652 = vmatpush3.bf16.msra.mxu1 %v651_v56  ;;  %v370_v55 = vld [vmem:[#allocation6 + $0x78] sm:$0xff] }
 0x12e   :  { %684 = vmatprep.subr.bf16.mxu0 %v802_v0  ;;  %654 = vmatprep.subr.bf16.mxu1 %v653_v60  ;;  %v679_v56 = vpack.c.bf16 %v370_v55, %v369_v54 }
 0x131   :  { %686 = vmatpush1.bf16.msra.mxu0 %v685_v63  ;;  %656 = vmatpush3.bf16.msra.mxu1 %v655_v2 }
 0x132   :  { %687 = vmatprep.subr.bf16.mxu0 %v802_v0  ;;  %658 = vmatprep.subr.bf16.mxu1 %v657_v8 }
 0x135   :  { %689 = vmatpush1.bf16.msra.mxu0 %v688_v5  ;;  %660 = vmatpush3.bf16.msra.mxu1 %v659_v11 }
 0x136   :  { %690 = vmatprep.subr.bf16.mxu0 %v802_v0  ;;  %662 = vmatprep.subr.bf16.mxu1 %v661_v17 }
 0x139   :  { %692 = vmatpush1.bf16.msra.mxu0 %v691_v14  ;;  %664 = vmatpush3.bf16.msra.mxu1 %v663_v20 }
 0x13a   :  { %693 = vmatprep.subr.bf16.mxu0 %v802_v0  ;;  %666 = vmatprep.subr.bf16.mxu1 %v665_v26 }
 0x13d   :  { %695 = vmatpush1.bf16.msra.mxu0 %v694_v23  ;;  %668 = vmatpush3.bf16.msra.mxu1 %v667_v29 }
 0x13e   :  { %696 = vmatprep.subr.bf16.mxu0 %v802_v0  ;;  %670 = vmatprep.subr.bf16.mxu1 %v669_v35 }
 0x141   :  { %698 = vmatpush1.bf16.msra.mxu0 %v697_v32  ;;  %672 = vmatpush3.bf16.msra.mxu1 %v671_v38 }
 0x142   :  { %699 = vmatprep.subr.bf16.mxu0 %v802_v0  ;;  %674 = vmatprep.subr.bf16.mxu1 %v673_v44 }
 0x145   :  { %701 = vmatpush1.bf16.msra.mxu0 %v700_v41  ;;  %676 = vmatpush3.bf16.msra.mxu1 %v675_v47 }
 0x146   :  { %702 = vmatprep.subr.bf16.mxu0 %v802_v0  ;;  %678 = vmatprep.subr.bf16.mxu1 %v677_v53 }
 0x149   :  { %704 = vmatpush1.bf16.msra.mxu0 %v703_v50  ;;  %680 = vmatpush3.bf16.msra.mxu1 %v679_v56 }
 0x14a   :  { %513 = vmatprep.subr.mxu0 %v804_v1 }
 0x14d   :  { %571 = vmatpush1.msk.msra.mxu0 %vm68_vm1, %v403_v57 }
 0x1ff   :  { %v250_v58 = vpop.f32.mrb[2].mxu1  ;;  %v321_v0 = vpop.f32.mrb[0].mxu0 }
 0x200   :  { %v330_v59 = vmin.f32 %v250_v58, 0.0  ;;  %v332_v60 = vmin.f32 %v321_v0, 0.0  ;;  %v252_v61 = vpop.f32.mrb[3].mxu1  ;;  %v323_v62 = vpop.f32.mrb[1].mxu0  ;;  %v326_v12 = vmax.f32 %v250_v58, 0.0  ;;  %v328_v22 = vmax.f32 %v321_v0, 0.0 }
 0x201   :  { %v331_v63 = vmin.f32 %v252_v61, 0.0  ;;  %v333_v2 = vmin.f32 %v323_v62, 0.0  ;;  %v327_v18 = vmax.f32 %v252_v61, 0.0  ;;  %v329_v20 = vmax.f32 %v323_v62, 0.0 }
 0x202   :  { %v334_v3 = vmul.f32 1.442695, %v330_v59  ;;  %v338_v4 = vmul.f32 1.442695, %v332_v60 }
 0x203   :  { %v336_v5 = vmul.f32 1.442695, %v331_v63  ;;  %v340_v6 = vmul.f32 1.442695, %v333_v2 }
 0x204   :  { %717 = vpow2.f32 %v334_v3 }
 0x205   :  { %719 = vpow2.f32 %v338_v4 }
 0x206   :  { %721 = vpow2.f32 %v336_v5 }
 0x207   :  { %723 = vpow2.f32 %v340_v6 }
 0x20e   :  { %v718_v1 = vpop.eup %717 }
 0x20f   :  { %v720_v7 = vpop.eup %719  ;;  %v567_v8 = vadd.f32 -1.0, %v718_v1 }
 0x210   :  { %v722_v9 = vpop.eup %721  ;;  %v569_v10 = vadd.f32 -1.0, %v720_v7 }
 0x211   :  { %v724_v11 = vpop.eup %723  ;;  %v346_v13 = vmin.f32 %v567_v8, 0.0  ;;  %v568_v14 = vadd.f32 -1.0, %v722_v9 }
 0x212   :  { %v570_v15 = vadd.f32 -1.0, %v724_v11  ;;  %v348_v17 = vmin.f32 %v569_v10, 0.0 }
 0x213   :  { %v350_v16 = vadd.f32 %v346_v13, %v326_v12  ;;  %v347_v19 = vmin.f32 %v568_v14, 0.0 }
 0x214   :  { %v349_v21 = vmin.f32 %v570_v15, 0.0  ;;  %v352_v25 = vadd.f32 %v348_v17, %v328_v22 }
 0x215   :  { %354 = vst [vmem:[%s903_s4] sm:$0xff] %v350_v16  ;;  %v351_v23 = vadd.f32 %v347_v19, %v327_v18 }
 0x216   :  { %v353_v24 = vadd.f32 %v349_v21, %v329_v20 }
 0x217   :  { %475 = vmatprep.mubr.f32.mxu1 %v351_v23 }
 0x218   :  { %572 = vmatprep.mubr.msk.f32.mxu0 %vm404_vm3, %v353_v24  ;;  %476 = vmatmul.mubr.f32.vlgmr.msra.gmra.mrb[4].mxu1 %v350_v16 }
 0x219   :  { %546 = vmatmul.mubr.f32.vlgmr.msra.gmra.mrb[2].mxu0 %v352_v25 }
 0x2eb   :  { %v611_v26 = vpop.f32.mrb[4].mxu1 }
 0x2ec   :  { %v547_v27 = vpop.f32.mrb[2].mxu0  ;;  %v612_v28 = vpop.f32.mrb[5].mxu1 }
 0x2ed   :  { %v613_v29 = vadd.f32 %v612_v28, %v611_v26  ;;  %v549_v30 = vpop.f32.mrb[3].mxu0 }
 0x2ef   :  { %v548_v31 = vadd.f32 %v613_v29, %v547_v27 }
 0x2f1   :  { %551 = vst [vmem:[%s903_s4 + $0x8] sm:$0xff] %v548_v31 }
 0x2f2   :  { %556 = vsyncpa [#allocation3], 1 }
 0x2f3   :  { %557 = vsyncpa [#allocation5], 1 }

</bundles_post_ra>
